<compile_context>
chip_gen: v5e
topology: v5e:2x2
jax: 0.10.0
libtpu: 0.0.40
codegen_flags: <defaults>
</compile_context>

<pallas_src>
import math

import jax
import jax.numpy as jnp
from jax.experimental import pallas as pl
from jax.experimental.pallas import tpu as pltpu


def _round_up(x, m):
    return ((x + m - 1) // m) * m


def _pick_tile(dim, preferred, base):
    """Tile size (multiple of `base`, <= preferred) and padded dim (multiple
    of the tile) for one matmul axis."""
    t = min(preferred, _round_up(dim, base))
    t = max(base, (t // base) * base)
    return t, _round_up(dim, t)


def _sublane_base(dtype):
    # Sublane packing: f32 -> 8, bf16 -> 16, int8/fp8 -> 32 rows per vreg tile.
    return max(8, 32 // jnp.dtype(dtype).itemsize)


# ---------------------------------------------------------------------------
# Kernels
# ---------------------------------------------------------------------------

def _resident_linear_kernel(x_ref, w_ref, b_ref, o_ref):
    # Whole (K, N_pad) weight and (1, N_pad) bias stay resident in VMEM
    # (constant index_map); 1-D grid over M tiles only.
    acc = jnp.dot(x_ref[...], w_ref[...], preferred_element_type=jnp.float32)
    o_ref[...] = (acc + b_ref[...]).astype(o_ref.dtype)


def _tiled_linear_kernel_f32out(x_ref, w_ref, b_ref, o_ref):
    # f32 output: accumulate directly into the resident output block; no
    # separate VMEM accumulator (saves a tm*tn*4B RMW per K step).
    k = pl.program_id(2)

    @pl.when(k == 0)
    def _init():
        o_ref[...] = jnp.zeros_like(o_ref)

    o_ref[...] += jnp.dot(x_ref[...], w_ref[...],
                          preferred_element_type=jnp.float32)

    @pl.when(k == pl.num_programs(2) - 1)
    def _finalize():
        o_ref[...] += b_ref[...]


def _tiled_linear_kernel_acc(x_ref, w_ref, b_ref, o_ref, acc_ref):
    # Narrow output dtype: keep an f32 VMEM accumulator, cast at the end.
    k = pl.program_id(2)

    @pl.when(k == 0)
    def _init():
        acc_ref[...] = jnp.zeros_like(acc_ref)

    acc_ref[...] += jnp.dot(x_ref[...], w_ref[...],
                            preferred_element_type=jnp.float32)

    @pl.when(k == pl.num_programs(2) - 1)
    def _finalize():
        o_ref[...] = (acc_ref[...] + b_ref[...]).astype(o_ref.dtype)


# ---------------------------------------------------------------------------
# Module wrapper
# ---------------------------------------------------------------------------

_RESIDENT_WEIGHT_BYTES_LIMIT = 4 * 1024 * 1024  # full weight kept in VMEM below this
_XLA_FALLBACK_FLOPS = 1_000_000                 # tiny problems: plain XLA dot wins


class ReactionPredictorPallas:
    """Pallas TPU equivalent of `ReactionPredictor` (a single nn.Linear).

    Weight is transposed + padded once at construction. Forward uses a
    resident-weight 1-D-grid kernel when the weight fits VMEM, otherwise a
    tiled M/N/K GEMM; optionally bypasses Pallas entirely for tiny problems.
    """

    def __init__(self, weight, bias, *, tm=256, tn=256, tk=512,
                 param_dtype=None, allow_xla_fallback=True,
                 force_path="auto", vmem_limit_bytes=None):
        self.out_features, self.in_features = weight.shape
        self.allow_xla_fallback = allow_xla_fallback
        self.vmem_limit_bytes = vmem_limit_bytes
        self.tm_pref = tm

        if param_dtype is not None:
            weight = weight.astype(param_dtype)
        self.compute_dtype = weight.dtype

        self.N_pad = _round_up(self.out_features, 128)
        w_bytes = self.in_features * self.N_pad * jnp.dtype(weight.dtype).itemsize
        if force_path == "resident":
            self.resident = True
        elif force_path == "tiled":
            self.resident = False
        else:
            self.resident = w_bytes <= _RESIDENT_WEIGHT_BYTES_LIMIT

        # One-time transpose + pad (cached at "model init", never per call).
        w_t = weight.T  # (in_features, out_features)
        if self.resident:
            # K stays exactly in_features (block dim == full array dim), so
            # activations are never padded along K per forward call.
            self.tk = self.K_pad = self.in_features
            self.tn = self.N_pad
            pad_n = self.N_pad - self.out_features
            if pad_n:
                w_t = jnp.pad(w_t, ((0, 0), (0, pad_n)))
        else:
            self.tn, self.N_pad = _pick_tile(self.out_features, tn, 128)
            self.tk, self.K_pad = _pick_tile(self.in_features, tk, 128)
            pad_n = self.N_pad - self.out_features
            pad_k = self.K_pad - self.in_features
            if pad_n or pad_k:
                w_t = jnp.pad(w_t, ((0, pad_k), (0, pad_n)))
        self.w_t = w_t  # (K[_pad], N_pad)

        b32 = bias.astype(jnp.float32)
        pad_n = self.N_pad - self.out_features
        if pad_n:
            b32 = jnp.pad(b32, (0, pad_n))
        self.b_pad = b32.reshape(1, self.N_pad)

    def __call__(self, x):
        *lead, in_features = x.shape
        assert in_features == self.in_features
        out_dtype = x.dtype
        x2 = x.reshape(-1, in_features)
        if x2.dtype != self.compute_dtype:
            # Explicit cast so the MXU runs at the weight's rate (e.g. bf16).
            x2 = x2.astype(self.compute_dtype)
        M = x2.shape[0]

        flops = 2 * M * self.in_features * self.out_features
        if self.allow_xla_fallback and flops < _XLA_FALLBACK_FLOPS:
            # Launch + pipeline prologue of a pallas_call dwarfs ~KFLOP matmuls;
            # a fused XLA dot is strictly faster there.
            out = (jnp.dot(x2, self.w_t[: self.in_features, : self.out_features],
                           preferred_element_type=jnp.float32)
                   + self.b_pad[0, : self.out_features]).astype(out_dtype)
            return out.reshape(*lead, self.out_features)

        # dtype-aware sublane base for both the compute and the output dtype.
        base = max(_sublane_base(x2.dtype), _sublane_base(out_dtype))
        tm, M_pad = _pick_tile(M, self.tm_pref, base)
        pad_m = M_pad - M
        pad_k = self.K_pad - in_features  # 0 on the resident fast path
        if pad_m or pad_k:
            x2 = jnp.pad(x2, ((0, pad_m), (0, pad_k)))

        cparams = dict(
            dimension_semantics=(("parallel",) if self.resident
                                 else ("parallel", "parallel", "arbitrary")),
        )
        if self.vmem_limit_bytes is not None:
            cparams["vmem_limit_bytes"] = self.vmem_limit_bytes

        itemsize = jnp.dtype(self.compute_dtype).itemsize
        cost = pl.CostEstimate(
            flops=2 * M_pad * self.K_pad * self.N_pad,
            transcendentals=0,
            bytes_accessed=(M_pad * self.K_pad * itemsize
                            + self.K_pad * self.N_pad * itemsize
                            + self.N_pad * 4
                            + M_pad * self.N_pad * jnp.dtype(out_dtype).itemsize),
        )

        if self.resident:
            out_pad = pl.pallas_call(
                _resident_linear_kernel,
                out_shape=jax.ShapeDtypeStruct((M_pad, self.N_pad), out_dtype),
                grid=(M_pad // tm,),
                in_specs=[
                    pl.BlockSpec((tm, self.K_pad), lambda i: (i, 0)),          # x
                    pl.BlockSpec((self.K_pad, self.N_pad), lambda i: (0, 0)),  # W^T (resident)
                    pl.BlockSpec((1, self.N_pad), lambda i: (0, 0)),           # bias (resident)
                ],
                out_specs=pl.BlockSpec((tm, self.N_pad), lambda i: (i, 0)),
                compiler_params=pltpu.CompilerParams(**cparams),
                cost_estimate=cost,
            )(x2, self.w_t, self.b_pad)
        else:
            grid = (M_pad // tm, self.N_pad // self.tn, self.K_pad // self.tk)
            common = dict(
                out_shape=jax.ShapeDtypeStruct((M_pad, self.N_pad), out_dtype),
                grid=grid,
                in_specs=[
                    pl.BlockSpec((tm, self.tk), lambda i, j, k: (i, k)),       # x tile
                    pl.BlockSpec((self.tk, self.tn), lambda i, j, k: (k, j)),  # W^T tile
                    pl.BlockSpec((1, self.tn), lambda i, j, k: (0, j)),        # bias tile
                ],
                out_specs=pl.BlockSpec((tm, self.tn), lambda i, j, k: (i, j)),
                compiler_params=pltpu.CompilerParams(**cparams),
                cost_estimate=cost,
            )
            if jnp.dtype(out_dtype) == jnp.dtype(jnp.float32):
                out_pad = pl.pallas_call(
                    _tiled_linear_kernel_f32out, **common)(x2, self.w_t, self.b_pad)
            else:
                out_pad = pl.pallas_call(
                    _tiled_linear_kernel_acc,
                    scratch_shapes=[pltpu.VMEM((tm, self.tn), jnp.float32)],
                    **common)(x2, self.w_t, self.b_pad)

        out = out_pad[:M, : self.out_features]
        return out.reshape(*lead, self.out_features)


def reaction_predictor_forward(x, weight, bias):
    """One-shot convenience wrapper matching nn.Linear semantics.
    (In a real model, construct ReactionPredictorPallas once and reuse it so
    the transposed/padded parameters are cached across calls.)"""
    return ReactionPredictorPallas(weight, bias)(x)


if __name__ == "__main__":
    # Small shapes consistent with the module: batch=8, input_size=32, output_size=16.
    batch, input_size, output_size = 8, 32, 16

    key = jax.random.PRNGKey(0)
    kx, kw, kb = jax.random.split(key, 3)

    # Deterministic init mimicking torch.nn.Linear default:
    # uniform(-1/sqrt(in_features), 1/sqrt(in_features)).
    bound = 1.0 / math.sqrt(input_size)
    weight = jax.random.uniform(kw, (output_size, input_size), jnp.float32,
                                minval=-bound, maxval=bound)
    bias = jax.random.uniform(kb, (output_size,), jnp.float32,
                              minval=-bound, maxval=bound)
    x = jax.random.normal(kx, (batch, input_size), jnp.float32)

    ref = x @ weight.T + bias

    # 1) Resident-weight fast path (natural path for these shapes).
    #    Fallback disabled so the Pallas kernel itself is exercised.
    model = ReactionPredictorPallas(weight, bias, allow_xla_fallback=False)
    out = jax.block_until_ready(model(x))
    assert out.shape == (batch, output_size)
    assert jnp.allclose(out, ref, atol=1e-5, rtol=1e-5)

    # 2) Tiled M/N/K path (forced; normally only used when W exceeds VMEM),
    #    f32 output -> direct accumulation into the output block.
    model_tiled = ReactionPredictorPallas(weight, bias, force_path="tiled",
                                          allow_xla_fallback=False)
    out_t = jax.block_until_ready(model_tiled(x))
    assert jnp.allclose(out_t, ref, atol=1e-5, rtol=1e-5)

    # 3) Tiled path with a narrow output dtype (bf16) -> f32 VMEM accumulator.
    x_bf16 = x.astype(jnp.bfloat16)
    ref_bf16 = (x_bf16.astype(jnp.float32) @ weight.T + bias).astype(jnp.bfloat16)
    out_b = jax.block_until_ready(model_tiled(x_bf16))
    assert out_b.dtype == jnp.bfloat16
    assert jnp.allclose(out_b.astype(jnp.float32), ref_bf16.astype(jnp.float32),
                        atol=2e-2, rtol=2e-2)

    # 4) Default behavior for this tiny module: XLA bypass (no pallas_call).
    model_auto = ReactionPredictorPallas(weight, bias)
    out_a = jax.block_until_ready(model_auto(x))
    assert jnp.allclose(out_a, ref, atol=1e-5, rtol=1e-5)

    print("KERNEL_OK")
</pallas_src>

<mosaic_0001>
module attributes {stable_mosaic.version = 11 : i64} {
  func.func @_resident_linear_kernel(%arg0: i32, %arg1: memref<8x32xf32, #tpu.memory_space<vmem>>, %arg2: memref<32x128xf32, #tpu.memory_space<vmem>>, %arg3: memref<1x128xf32, #tpu.memory_space<vmem>>, %arg4: memref<8x128xf32, #tpu.memory_space<vmem>>) attributes {dimension_semantics = [#tpu.dimension_semantics<parallel>], iteration_bounds = array<i64: 1>, scalar_prefetch = 0 : i64, scratch_operands = 0 : i64, tpu.core_type = #tpu.core_type<tc>, window_params = [{transform_indices = @transform_0, window_bounds = array<i64: 8, 32>}, {pipeline_mode = #tpu.pipeline_mode<synchronous>, transform_indices = @transform_1, window_bounds = array<i64: 32, 128>}, {pipeline_mode = #tpu.pipeline_mode<synchronous>, transform_indices = @transform_2, window_bounds = array<i64: 1, 128>}, {transform_indices = @transform_3, window_bounds = array<i64: 8, 128>}]} {
    %c0 = arith.constant 0 : index
    %c0_0 = arith.constant 0 : index
    %0 = vector.load %arg1[%c0, %c0_0] : memref<8x32xf32, #tpu.memory_space<vmem>>, vector<8x32xf32>
    %c0_1 = arith.constant 0 : index
    %c0_2 = arith.constant 0 : index
    %1 = vector.load %arg2[%c0_1, %c0_2] : memref<32x128xf32, #tpu.memory_space<vmem>>, vector<32x128xf32>
    %cst = arith.constant dense<0.000000e+00> : vector<8x128xf32>
    %2 = tpu.matmul %0, %1, %cst {dimension_numbers = #tpu.dot_dimension_numbers<[1], [0], [0], [1], [0, 0, 1, 1], [], []>} : vector<8x32xf32>, vector<32x128xf32>, vector<8x128xf32> -> vector<8x128xf32>
    %c0_3 = arith.constant 0 : index
    %c0_4 = arith.constant 0 : index
    %3 = vector.load %arg3[%c0_3, %c0_4] : memref<1x128xf32, #tpu.memory_space<vmem>>, vector<1x128xf32>
    %4 = vector.broadcast %3 : vector<1x128xf32> to vector<8x128xf32>
    %5 = arith.addf %2, %4 : vector<8x128xf32>
    %c0_5 = arith.constant 0 : index
    %c0_6 = arith.constant 0 : index
    %6 = vector.load %arg4[%c0_5, %c0_6] : memref<8x128xf32, #tpu.memory_space<vmem>>, vector<8x128xf32>
    tpu.vector_store %arg4[%c0_5, %c0_6], %5 {strides = array<i32>} : memref<8x128xf32, #tpu.memory_space<vmem>>, vector<8x128xf32>,
    return
  }
  func.func @transform_0(%arg0: i32) -> (i32, i32) {
    %c0_i32 = arith.constant 0 : i32
    %c0_i32_0 = arith.constant 0 : i32
    return %arg0, %c0_i32 : i32, i32
  }
  func.func @transform_1(%arg0: i32) -> (i32, i32) {
    %c0_i32 = arith.constant 0 : i32
    %c0_i32_0 = arith.constant 0 : i32
    %c0_i32_1 = arith.constant 0 : i32
    return %c0_i32, %c0_i32_0 : i32, i32
  }
  func.func @transform_2(%arg0: i32) -> (i32, i32) {
    %c0_i32 = arith.constant 0 : i32
    %c0_i32_0 = arith.constant 0 : i32
    %c0_i32_1 = arith.constant 0 : i32
    return %c0_i32, %c0_i32_0 : i32, i32
  }
  func.func @transform_3(%arg0: i32) -> (i32, i32) {
    %c0_i32 = arith.constant 0 : i32
    %c0_i32_0 = arith.constant 0 : i32
    return %arg0, %c0_i32 : i32, i32
  }
}

</mosaic_0001>

<bundles_post_ra>
// kernel: tpu_custom_call.1
= control target key start
LH: loop header
LB: loop body
LE: loop exit
PB: predicated region body
PF: predicated region fallthrough
CT: control target
= control target key end

     0   :  { %8 = vsyncpa [#allocation3], 0  ;;  %s219_s0 = inlined_call_operand.hbm [shape: f32[8,32], index: 0, kind: input, shape index: {}]   ;;  %s220_s1 = inlined_call_operand.hbm [shape: f32[32,128], index: 1, kind: input, shape index: {}]   ;;  %s221_s2 = inlined_call_operand.vmem [shape: f32[1,128], index: 2, kind: input, shape index: {}]   ;;  %s222_s3 = inlined_call_operand.hbm [shape: f32[8,128], index: 3, kind: output, shape index: {}]  }
   0x1   :  { %9 = vsyncpa [#allocation6], 0 }
   0x2   :  { %10 = vsyncpa [#allocation4], 0  ;;  %s16_s14 = sshll.u32 %s219_s0, 4  ;;  %s182_s15 = smov [#allocation2]   ;;  %s17_s14 = int_to_ptr.hbm [resolvable:$true] %s16_s14 }
   0x3   :  { %s18_s16 = sshll.u32 %s182_s15, 4  ;;  %s26_s19 = sshll.u32 %s220_s1, 4  ;;  %s19_s16 = int_to_ptr.vmem [resolvable:$true] %s18_s16  ;;  %s27_s19 = int_to_ptr.hbm [resolvable:$true] %s26_s19 }
   0x4   :  { %21 = dma.hbm_to_vmem [thread:$0]  %s17_s14, 128, %s19_s16, [#allocation3]  }
   0x5   :  { %s183_s20 = smov [#allocation5]   ;;  %s184_s22 = smov 128  }
   0x6   :  { %s28_s21 = sshll.u32 %s183_s20, 4  ;;  %s185_s23 = smov 8   ;;  %s29_s21 = int_to_ptr.vmem [resolvable:$true] %s28_s21 }
   0x7   :  { %34 = dma.hbm_to_vmem [thread:$0]  %s27_s19, 512, %s29_s21, [#allocation6], %s184_s22, %s184_s22, %s185_s23  }
   0x8   :  { %176 = dma.done.wait [#allocation3], 128  }
   0x9   :  { %177 = vsyncadd [#allocation3], 4294967168 }
   0xa   :  { %178 = dma.done.wait [#allocation6], 512  }
   0xb   :  { %179 = vsyncadd [#allocation6], 4294966784  ;;  %v49_v0 = vld [vmem:[#allocation5 + $0x18] sm:$0xff]  ;;  %v48_v1 = vld [vmem:[#allocation5 + $0x10] sm:$0xff]  ;;  %vm54_vm0 = vcmask 261120   ;;  %s186_s24 = smov [#allocation7]  }
   0xc   :  { %70 = vmatpush.msra.mxu0 %v49_v0  ;;  %v47_v2 = vld [vmem:[#allocation5 + $0x8] sm:$0xff]  ;;  %v46_v3 = vld [vmem:[#allocation5] sm:$0xff]  ;;  %v45_v4 = vld [vmem:[#allocation2] sm:$0xff]  ;;  %s84_s25 = sshll.u32 %s186_s24, 4  ;;  %s86_s28 = sshll.u32 %s222_s3, 4  ;;  %s85_s25 = int_to_ptr.vmem [resolvable:$true] %s84_s25  ;;  %s87_s28 = int_to_ptr.hbm [resolvable:$true] %s86_s28 }
   0xd   :  { %v103_v5 = vld [vmem:[%s221_s2] ss:$0 sm:$0xff] }
   0xe   :  { %71 = vmatpush.msra.mxu0 %v48_v1 }
  0x10   :  { %72 = vmatpush.msra.mxu0 %v47_v2 }
  0x12   :  { %73 = vmatpush.msra.mxu0 %v46_v3 }
  0x13   :  { %97 = vmatmul.msk.f32.vlgmr.msra.gmra.mxu0 %vm54_vm0, %v45_v4 }
  0x90   :  { %v75_v6 = vpop.f32.mrf.mxu0 }
  0x91   :  { %v76_v7 = vadd.f32 %v103_v5, %v75_v6 }
  0x93   :  { %78 = vst [vmem:[#allocation7] sm:$0xff] %v76_v7 }
  0x94   :  { %89 = dma.vmem_to_hbm [thread:$0]  %s85_s25, 128, %s87_s28, [#allocation4]  }
  0x95   :  { %180 = dma.done.wait [#allocation4], 128  }
  0x96   :  { %181 = vsyncadd [#allocation4], 4294967168 }
  0x97   :  { %94 = vsyncpa [#allocation3], 1 }
  0x98   :  { %95 = vsyncpa [#allocation6], 1 }
  0x99   :  { %96 = vsyncpa [#allocation4], 1 }

</bundles_post_ra>
